<compile_context>
chip_gen: v7x
topology: tpu7x:2x2x1
jax: 0.10.0
libtpu: 0.0.40
codegen_flags: <defaults>
</compile_context>

<pallas_src>
import functools

import jax
import jax.numpy as jnp
from jax.experimental import pallas as pl
from jax.experimental.pallas import tpu as pltpu

_ROW_ALIGN = 16  # multiple of both the f32 (8) and bf16 (16) sublane packing


def _round_up(x, m):
    return int(pl.cdiv(int(x), m)) * m


# ----------------------------------------------------------------------------
# Fused kernel: for one (timestep, row-tile) grid point, run the entire MLP
# stack with all layer weights resident in VMEM.
#   x_ref: (1, tn, Kin)   w_ref: (1, L, Kmax, Nmax)   b_ref: (1, L, 1, Nmax)
#   o_ref: (1, tn, Dout_p)
# ----------------------------------------------------------------------------
def _fused_mlp_kernel(x_ref, w_ref, b_ref, o_ref, *, k_pad, n_pad, nonlinear):
    num_layers = len(k_pad)
    h = x_ref[0]                                    # (tn, k_pad[0]) compute dtype
    for l in range(num_layers):                     # static unroll; L is small
        # Static slices -> only the real (padded) dims hit the MXU.
        w = w_ref[0, l, :k_pad[l], :n_pad[l]]       # (k, n) compute dtype
        b = b_ref[0, l, :, :n_pad[l]]               # (1, n) f32
        h = jnp.dot(h.astype(w.dtype), w,
                    preferred_element_type=jnp.float32) + b
        if nonlinear and l < num_layers - 1:
            h = jnp.maximum(h, 0.0)                 # ReLU on hidden layers (f32)
    o_ref[0] = h.astype(o_ref.dtype)


# ----------------------------------------------------------------------------
# One-time weight packing (outside the jitted per-forward path).
# raw_params: list (duration) of lists (layer_num) of (W, b) in PyTorch layout
#   W: (dout, din), b: (dout,)
# Returns (w_all, b_all, meta):
#   w_all: (T, L_eff, Kmax, Nmax) compute_dtype, transposed to (in, out) and
#          zero-padded per layer to (k_pad[l], n_pad[l]).
#   b_all: (T, L_eff, 1, Nmax) float32.
#   meta:  static kwargs for mlp_classifier_forward.
# For trans_version='L' the whole linear stack is folded into one affine (f32).
# ----------------------------------------------------------------------------
def pack_mlp_classifier_params(raw_params, *, trans_version='N',
                               compute_dtype=jnp.bfloat16):
    T = len(raw_params)
    nonlinear = (trans_version == 'N')

    eff = []  # per timestep: list of (Wt (din, dout), b (dout,)) in f32
    for layers in raw_params:
        lt = [(jnp.asarray(W, jnp.float32).T, jnp.asarray(b, jnp.float32))
              for (W, b) in layers]
        if not nonlinear:                           # 'L': exact fold to one affine
            Wt, bt = lt[0]
            for (W2, b2) in lt[1:]:
                Wt = Wt @ W2
                bt = bt @ W2 + b2
            lt = [(Wt, bt)]
        eff.append(lt)

    L = len(eff[0])
    din = [int(eff[0][l][0].shape[0]) for l in range(L)]
    dout = [int(eff[0][l][0].shape[1]) for l in range(L)]
    # Layer-0 contraction only needs 8-sublane alignment (matches the x padding);
    # later contractions must match the previous lane-dense activation width.
    k_pad = [_round_up(din[0], 8)] + [_round_up(d, 128) for d in din[1:]]
    n_pad = [_round_up(d, 128) for d in dout]
    Kmax, Nmax = max(k_pad), max(n_pad)

    w_np = jnp.zeros((T, L, Kmax, Nmax), jnp.float32)
    b_np = jnp.zeros((T, L, 1, Nmax), jnp.float32)
    for t in range(T):
        for l, (Wt, b) in enumerate(eff[t]):
            w_np = w_np.at[t, l, :din[l], :dout[l]].set(Wt)
            b_np = b_np.at[t, l, 0, :dout[l]].set(b)
    meta = dict(k_pad=tuple(k_pad), n_pad=tuple(n_pad),
                nonlinear=nonlinear, output_dim=dout[-1])
    return w_np.astype(compute_dtype), b_np, meta


# ----------------------------------------------------------------------------
# Fused forward over all timesteps: x_stack (T, N, Din) -> (T, N, output_dim)
# ----------------------------------------------------------------------------
def _fused_forward(x_stack, w_all, b_all, *, k_pad, n_pad, nonlinear,
                   output_dim, tn=None):
    T, N, Din = x_stack.shape
    L, Kmax, Nmax = w_all.shape[1], w_all.shape[2], w_all.shape[3]
    Kin, Dout_p = k_pad[0], n_pad[-1]
    compute_dtype = w_all.dtype
    itemsize = jnp.dtype(compute_dtype).itemsize

    # Row tiling: large tiles amortize the ~0.35us per-grid-step cost; shrink
    # the tile when the total grid is tiny so both v7x TensorCores get work.
    tn_eff = 512 if tn is None else tn
    tn_eff = min(_round_up(tn_eff, _ROW_ALIGN), _round_up(N, _ROW_ALIGN))
    row_blocks = int(pl.cdiv(N, tn_eff))
    if T * row_blocks < 4:
        want = max(2, int(pl.cdiv(4, T)))
        tn_try = _round_up(int(pl.cdiv(N, want)), _ROW_ALIGN)
        if tn_try >= _ROW_ALIGN and int(pl.cdiv(N, tn_try)) > row_blocks:
            tn_eff = tn_try
            row_blocks = int(pl.cdiv(N, tn_eff))
    n_rows = row_blocks * tn_eff

    # Rows padded to the tile; features only to the 8-aligned Kin (NOT to 128),
    # so small Din does not inflate input HBM traffic.  Pre-cast once so the
    # first layer needs no in-kernel cast (keeps v5e VPU work minimal).
    x_p = jnp.zeros((T, n_rows, Kin), compute_dtype)
    x_p = x_p.at[:, :N, :Din].set(x_stack.astype(compute_dtype))

    flops = 2 * T * n_rows * sum(k * n for k, n in zip(k_pad, n_pad))
    bytes_accessed = (x_p.size * itemsize + w_all.size * itemsize
                      + b_all.size * 4 + T * n_rows * Dout_p * 4)
    # VMEM budget: double-buffered x/out tiles + weight/bias blocks (+ slack).
    blk_bytes = 2 * (tn_eff * Kin * itemsize + tn_eff * Dout_p * 4
                     + L * Kmax * Nmax * itemsize + L * Nmax * 4)
    vmem_limit = int(min(max(blk_bytes + (8 << 20), 32 << 20), 64 << 20))

    out = pl.pallas_call(
        functools.partial(_fused_mlp_kernel, k_pad=tuple(k_pad),
                          n_pad=tuple(n_pad), nonlinear=nonlinear),
        out_shape=jax.ShapeDtypeStruct((T, n_rows, Dout_p), jnp.float32),
        grid=(T, row_blocks),   # rows innermost: weight block fetched once per t
        in_specs=[
            pl.BlockSpec((1, tn_eff, Kin), lambda t, i: (t, i, 0)),
            pl.BlockSpec((1, L, Kmax, Nmax), lambda t, i: (t, 0, 0, 0)),
            pl.BlockSpec((1, L, 1, Nmax), lambda t, i: (t, 0, 0, 0)),
        ],
        out_specs=pl.BlockSpec((1, tn_eff, Dout_p), lambda t, i: (t, i, 0)),
        compiler_params=pltpu.CompilerParams(
            dimension_semantics=("parallel", "parallel"),
            vmem_limit_bytes=vmem_limit),
        cost_estimate=pl.CostEstimate(flops=flops, transcendentals=0,
                                      bytes_accessed=bytes_accessed),
    )(x_p, w_all, b_all)
    return out[:, :N, :output_dim]


# ----------------------------------------------------------------------------
# MLPClassifier.forward semantics: list input -> list of outputs (one MLP per
# timestep); single array input -> uses mlp_list[0].
# ----------------------------------------------------------------------------
def mlp_classifier_forward(x_list, w_all, b_all, *, k_pad, n_pad, nonlinear,
                           output_dim, tn=None):
    kw = dict(k_pad=k_pad, n_pad=n_pad, nonlinear=nonlinear,
              output_dim=output_dim, tn=tn)
    if isinstance(x_list, (list, tuple)):
        x_stack = jnp.stack(list(x_list), axis=0)
        out = _fused_forward(x_stack, w_all, b_all, **kw)
        return [out[i] for i in range(len(x_list))]
    out = _fused_forward(x_list[None], w_all[:1], b_all[:1], **kw)
    return out[0]


# ----------------------------------------------------------------------------
# Pure-JAX f32 reference (for correctness check)
# ----------------------------------------------------------------------------
def ref_forward(x_list, raw_params, *, trans_version='N'):
    def one(x, layers):
        h = x
        L = len(layers)
        for l, (W, b) in enumerate(layers):
            h = h @ W.T + b
            if trans_version == 'N' and l < L - 1:
                h = jnp.maximum(h, 0.0)
        return h

    if isinstance(x_list, (list, tuple)):
        return [one(x_list[i], raw_params[i]) for i in range(len(x_list))]
    return one(x_list, raw_params[0])


# ----------------------------------------------------------------------------
# Deterministic parameter construction (shapes follow the module __init__)
# ----------------------------------------------------------------------------
def make_params(key, input_dim, hidden_dim, output_dim, layer_num, duration):
    def uniform(k, shape, fan_in):
        lim = 1.0 / (fan_in ** 0.5)
        return jax.random.uniform(k, shape, jnp.float32, -lim, lim)

    if layer_num == 1:
        dims = [(input_dim, output_dim)]
    else:
        dims = [(input_dim, hidden_dim)]
        dims += [(hidden_dim, hidden_dim)] * (layer_num - 2)
        dims += [(hidden_dim, output_dim)]

    ki = iter(jax.random.split(key, duration * layer_num * 2))
    raw = []
    for _ in range(duration):
        layers = []
        for (din, dout) in dims:
            W = uniform(next(ki), (dout, din), din)   # nn.Linear weight
            b = uniform(next(ki), (dout,), din)       # nn.Linear bias
            layers.append((W, b))
        raw.append(layers)
    return raw


if __name__ == "__main__":
    key = jax.random.PRNGKey(0)
    k1, k2, k3, k4 = jax.random.split(key, 4)

    # --- Config A: trans_version='N' (module default), bf16 MXU operands ------
    duration, N = 3, 200                      # N deliberately not tile-aligned
    input_dim, hidden_dim, output_dim, layer_num = 16, 32, 64, 3
    x_list = [jax.random.normal(k, (N, input_dim), jnp.float32)
              for k in jax.random.split(k1, duration)]
    raw = make_params(k2, input_dim, hidden_dim, output_dim, layer_num, duration)
    w_all, b_all, meta = pack_mlp_classifier_params(
        raw, trans_version='N', compute_dtype=jnp.bfloat16)
    fwd = jax.jit(functools.partial(mlp_classifier_forward, **meta))

    out_list = [jax.block_until_ready(o) for o in fwd(x_list, w_all, b_all)]
    ref_list = ref_forward(x_list, raw, trans_version='N')
    tol = 3e-2                                # bf16 operands, f32 accumulation
    assert len(out_list) == duration
    for o, r in zip(out_list, ref_list):
        assert o.shape == (N, output_dim)
        assert jnp.allclose(o, r, rtol=tol, atol=tol), float(jnp.abs(o - r).max())

    # Single-tensor path (uses mlp_list[0]).
    out_single = jax.block_until_ready(fwd(x_list[0], w_all, b_all))
    ref_single = ref_forward(x_list[0], raw, trans_version='N')
    assert out_single.shape == (N, output_dim)
    assert jnp.allclose(out_single, ref_single, rtol=tol, atol=tol)

    # --- Config B: trans_version='L' -> folded to one affine at pack time, f32 -
    duration_b, N_b = 2, 130
    in_b, hid_b, out_b, lnum_b = 96, 256, 8, 2
    xb = [jax.random.normal(k, (N_b, in_b), jnp.float32)
          for k in jax.random.split(k3, duration_b)]
    raw_b = make_params(k4, in_b, hid_b, out_b, lnum_b, duration_b)
    w_b, b_b, meta_b = pack_mlp_classifier_params(
        raw_b, trans_version='L', compute_dtype=jnp.float32)
    fwd_b = jax.jit(functools.partial(mlp_classifier_forward, **meta_b))
    out_b_list = [jax.block_until_ready(o) for o in fwd_b(xb, w_b, b_b)]
    ref_b_list = ref_forward(xb, raw_b, trans_version='L')
    for o, r in zip(out_b_list, ref_b_list):
        assert o.shape == (N_b, out_b)
        assert jnp.allclose(o, r, rtol=1e-3, atol=1e-3), float(jnp.abs(o - r).max())

    print("KERNEL_OK")
</pallas_src>

<mosaic_0001>
module attributes {stable_mosaic.version = 11 : i64} {
  func.func @_fused_mlp_kernel(%arg0: i32, %arg1: i32, %arg2: memref<1x112x16xbf16, #tpu.memory_space<vmem>>, %arg3: memref<1x3x128x128xbf16, #tpu.memory_space<vmem>>, %arg4: memref<1x3x1x128xf32, #tpu.memory_space<vmem>>, %arg5: memref<1x112x128xf32, #tpu.memory_space<vmem>>) attributes {dimension_semantics = [#tpu.dimension_semantics<parallel>, #tpu.dimension_semantics<parallel>], iteration_bounds = array<i64: 3, 2>, scalar_prefetch = 0 : i64, scratch_operands = 0 : i64, tpu.core_type = #tpu.core_type<tc>, window_params = [{transform_indices = @transform_0, window_bounds = array<i64: 1, 112, 16>}, {transform_indices = @transform_1, window_bounds = array<i64: 1, 3, 128, 128>}, {transform_indices = @transform_2, window_bounds = array<i64: 1, 3, 1, 128>}, {transform_indices = @transform_3, window_bounds = array<i64: 1, 112, 128>}]} {
    %c0 = arith.constant 0 : index
    %c0_0 = arith.constant 0 : index
    %c0_1 = arith.constant 0 : index
    %0 = vector.load %arg2[%c0, %c0_0, %c0_1] : memref<1x112x16xbf16, #tpu.memory_space<vmem>>, vector<1x112x16xbf16>
    %1 = vector.shape_cast %0 : vector<1x112x16xbf16> to vector<112x16xbf16>
    %c0_2 = arith.constant 0 : index
    %c0_3 = arith.constant 0 : index
    %c0_4 = arith.constant 0 : index
    %c0_5 = arith.constant 0 : index
    %2 = vector.load %arg3[%c0_2, %c0_3, %c0_4, %c0_5] : memref<1x3x128x128xbf16, #tpu.memory_space<vmem>>, vector<1x1x16x128xbf16>
    %3 = vector.shape_cast %2 : vector<1x1x16x128xbf16> to vector<16x128xbf16>
    %c0_6 = arith.constant 0 : index
    %c0_7 = arith.constant 0 : index
    %c0_8 = arith.constant 0 : index
    %c0_9 = arith.constant 0 : index
    %4 = vector.load %arg4[%c0_6, %c0_7, %c0_8, %c0_9] : memref<1x3x1x128xf32, #tpu.memory_space<vmem>>, vector<1x1x1x128xf32>
    %5 = vector.shape_cast %4 : vector<1x1x1x128xf32> to vector<1x128xf32>
    %cst = arith.constant dense<0.000000e+00> : vector<112x128xf32>
    %6 = tpu.matmul %1, %3, %cst {dimension_numbers = #tpu.dot_dimension_numbers<[1], [0], [0], [1], [0, 0, 1, 1], [], []>} : vector<112x16xbf16>, vector<16x128xbf16>, vector<112x128xf32> -> vector<112x128xf32>
    %7 = vector.broadcast %5 : vector<1x128xf32> to vector<112x128xf32>
    %8 = arith.addf %6, %7 : vector<112x128xf32>
    %cst_10 = arith.constant 0.000000e+00 : f32
    %9 = vector.broadcast %cst_10 : f32 to vector<112x128xf32>
    %10 = arith.maximumf %8, %9 : vector<112x128xf32>
    %c0_11 = arith.constant 0 : index
    %c1 = arith.constant 1 : index
    %c0_12 = arith.constant 0 : index
    %c0_13 = arith.constant 0 : index
    %11 = vector.load %arg3[%c0_11, %c1, %c0_12, %c0_13] : memref<1x3x128x128xbf16, #tpu.memory_space<vmem>>, vector<1x1x128x128xbf16>
    %12 = vector.shape_cast %11 : vector<1x1x128x128xbf16> to vector<128x128xbf16>
    %c0_14 = arith.constant 0 : index
    %c1_15 = arith.constant 1 : index
    %c0_16 = arith.constant 0 : index
    %c0_17 = arith.constant 0 : index
    %13 = vector.load %arg4[%c0_14, %c1_15, %c0_16, %c0_17] : memref<1x3x1x128xf32, #tpu.memory_space<vmem>>, vector<1x1x1x128xf32>
    %14 = vector.shape_cast %13 : vector<1x1x1x128xf32> to vector<1x128xf32>
    %15 = arith.truncf %10 : vector<112x128xf32> to vector<112x128xbf16>
    %cst_18 = arith.constant dense<0.000000e+00> : vector<112x128xf32>
    %16 = tpu.matmul %15, %12, %cst_18 {dimension_numbers = #tpu.dot_dimension_numbers<[1], [0], [0], [1], [0, 0, 1, 1], [], []>} : vector<112x128xbf16>, vector<128x128xbf16>, vector<112x128xf32> -> vector<112x128xf32>
    %17 = vector.broadcast %14 : vector<1x128xf32> to vector<112x128xf32>
    %18 = arith.addf %16, %17 : vector<112x128xf32>
    %cst_19 = arith.constant 0.000000e+00 : f32
    %19 = vector.broadcast %cst_19 : f32 to vector<112x128xf32>
    %20 = arith.maximumf %18, %19 : vector<112x128xf32>
    %c0_20 = arith.constant 0 : index
    %c2 = arith.constant 2 : index
    %c0_21 = arith.constant 0 : index
    %c0_22 = arith.constant 0 : index
    %21 = vector.load %arg3[%c0_20, %c2, %c0_21, %c0_22] : memref<1x3x128x128xbf16, #tpu.memory_space<vmem>>, vector<1x1x128x128xbf16>
    %22 = vector.shape_cast %21 : vector<1x1x128x128xbf16> to vector<128x128xbf16>
    %c0_23 = arith.constant 0 : index
    %c2_24 = arith.constant 2 : index
    %c0_25 = arith.constant 0 : index
    %c0_26 = arith.constant 0 : index
    %23 = vector.load %arg4[%c0_23, %c2_24, %c0_25, %c0_26] : memref<1x3x1x128xf32, #tpu.memory_space<vmem>>, vector<1x1x1x128xf32>
    %24 = vector.shape_cast %23 : vector<1x1x1x128xf32> to vector<1x128xf32>
    %25 = arith.truncf %20 : vector<112x128xf32> to vector<112x128xbf16>
    %cst_27 = arith.constant dense<0.000000e+00> : vector<112x128xf32>
    %26 = tpu.matmul %25, %22, %cst_27 {dimension_numbers = #tpu.dot_dimension_numbers<[1], [0], [0], [1], [0, 0, 1, 1], [], []>} : vector<112x128xbf16>, vector<128x128xbf16>, vector<112x128xf32> -> vector<112x128xf32>
    %27 = vector.broadcast %24 : vector<1x128xf32> to vector<112x128xf32>
    %28 = arith.addf %26, %27 : vector<112x128xf32>
    %c0_28 = arith.constant 0 : index
    %c0_29 = arith.constant 0 : index
    %c0_30 = arith.constant 0 : index
    %29 = vector.load %arg5[%c0_28, %c0_29, %c0_30] : memref<1x112x128xf32, #tpu.memory_space<vmem>>, vector<1x112x128xf32>
    %30 = vector.shape_cast %29 : vector<1x112x128xf32> to vector<112x128xf32>
    %31 = vector.shape_cast %28 : vector<112x128xf32> to vector<1x112x128xf32>
    tpu.vector_store %arg5[%c0_28, %c0_29, %c0_30], %31 {strides = array<i32>} : memref<1x112x128xf32, #tpu.memory_space<vmem>>, vector<1x112x128xf32>,
    return
  }
  func.func @transform_0(%arg0: i32, %arg1: i32) -> (i32, i32, i32) {
    %c0_i32 = arith.constant 0 : i32
    %c0_i32_0 = arith.constant 0 : i32
    return %arg0, %arg1, %c0_i32 : i32, i32, i32
  }
  func.func @transform_1(%arg0: i32, %arg1: i32) -> (i32, i32, i32, i32) {
    %c0_i32 = arith.constant 0 : i32
    %c0_i32_0 = arith.constant 0 : i32
    %c0_i32_1 = arith.constant 0 : i32
    %c0_i32_2 = arith.constant 0 : i32
    return %arg0, %c0_i32, %c0_i32_0, %c0_i32_1 : i32, i32, i32, i32
  }
  func.func @transform_2(%arg0: i32, %arg1: i32) -> (i32, i32, i32, i32) {
    %c0_i32 = arith.constant 0 : i32
    %c0_i32_0 = arith.constant 0 : i32
    %c0_i32_1 = arith.constant 0 : i32
    %c0_i32_2 = arith.constant 0 : i32
    return %arg0, %c0_i32, %c0_i32_0, %c0_i32_1 : i32, i32, i32, i32
  }
  func.func @transform_3(%arg0: i32, %arg1: i32) -> (i32, i32, i32) {
    %c0_i32 = arith.constant 0 : i32
    %c0_i32_0 = arith.constant 0 : i32
    return %arg0, %arg1, %c0_i32 : i32, i32, i32
  }
}

</mosaic_0001>

<bundles_post_ra>
// kernel: mlp_classifier_forward.1
= control target key start
LH: loop header
LB: loop body
LE: loop exit
PB: predicated region body
PF: predicated region fallthrough
CT: control target
= control target key end

     0   :  { %s1284_s12 = smov 0   ;;  %s1286_s13 = smov 0   ;;  %s1498_s0 = inlined_call_operand.vmem [shape: bf16[3,224,16], index: 0, kind: input, shape index: {}]   ;;  %s1499_s1 = inlined_call_operand.vmem [shape: bf16[3,3,128,128], index: 1, kind: input, shape index: {}]   ;;  %s1500_s2 = inlined_call_operand.vmem [shape: f32[3,3,1,128], index: 2, kind: input, shape index: {}]   ;;  %s1501_s3 = inlined_call_operand.vmem [shape: f32[3,224,128], index: 3, kind: output, shape index: {}]  }
   0x1   :  { %s1288_s14 = smov 0   ;;  %s1290_s15 = smov 0  }
   0x2   :  { %s1292_s16 = smov 0  }
   0x3 LB: > { %s22_s17 = sadd.s32 1, %s1252_s14  ;;  %s25_s18 = sadd.s32 1, %s1256_s15  ;;  %s1260_s16 = sphi %s1292_s16, %s13_s16   ;;  %s1256_s15 = sphi %s1290_s15, %s1505_s15   ;;  %s1252_s14 = sphi %s1288_s14, %s1504_s14   ;;  %s1248_s13 = sphi %s1286_s13, %s1503_s13   ;;  %s1244_s12 = sphi %s1284_s12, %s1502_s12  }
   0x4   : > { %p23_p0 = scmp.ge.s32.totalorder %s22_s17, 2  ;;  %p921_p1 = scmp.ge.s32.totalorder %s1260_s16, 1 }
   0x5   : > { %p177_p2 = scmp.lt.s32.totalorder %s1260_s16, 7 }
   0x6   : > { %s1507_s17 = smov (%p23_p0, %s22_s17), 0  ;;  %s1509_s18 = smov (!%p23_p0, %s25_s18), %s1256_s15 }
   0x7   : > { %p178_p3 = pnand %p921_p1, %p177_p2  ;;  %p27_p4 = scmp.ge.s32.totalorder %s1509_s18, 3 }
   0x8   : > { %p219_p5 = scmp.lt.s32.totalorder (!%p178_p3), %s1248_s13, 2  ;;  %s218_s19 = smul.u32 (!%p178_p3), 14, %s1244_s12  ;;  %v1262_v0 = vmov (!%p178_p3), 0.0   ;;  %vm1263_vm0 = vmmov (!%p178_p3), 0   ;;  %vm312_vm1 = vcmask (!%p178_p3), 130048  }
   0x9   : > { %s1511_s18 = smov (%p27_p4, %s1509_s18), 0  ;;  %181 = sbr.rel (%p178_p3) target bundleno = 729 (0x2d9), region = 32 }
   0xa   : > { %1033 = vmatprep.subr.bf16.mxu0 (!%p178_p3), %v1262_v0  ;;  %1035 = vmatprep.mubr.msk.bf16.mxu0 (!%p178_p3), %vm1263_vm0, %v1262_v0  ;;  %p221_p6 = scmp.lt.s32.totalorder (!%p178_p3), %s218_s19, 27 }
   0xb   : > { %1151 = vmatprep.subr.bf16.mxu1 (!%p178_p3), %v1262_v0  ;;  %1051 = vmatprep.mubr.msk.bf16.mxu1 (!%p178_p3), %vm1263_vm0, %v1262_v0 }
  0x10   : > { %s1513_s13 = smov (!%p219_p5, %s1248_s13), 2  ;;  %s1515_s19 = smov (!%p221_p6, %s218_s19), 27 }
  0x11   : > { %s1154_s20 = smul.u32 192, %s1513_s13 }
  0x12   : > { %s1153_s24 = smul.u32 28, %s1513_s13 }
  0x13   : > { %s1326_s23 = scalar_lea.vmem %s1499_s1, %s1154_s20  ;;  %s1155_s30 = smul.u32 3, %s1513_s13 }
  0x14   : > { %v1198_v1 = vld [vmem:[%s1326_s23] sm:$0xff]   ;;  %s1330_s25 = sadd.s32 %s1153_s24, %s1515_s19  ;;  %v1207_v6 = vld [vmem:[%s1326_s23 + $0x48] sm:$0xff]   ;;  %v1208_v7 = vld [vmem:[%s1326_s23 + $0x50] sm:$0xff]  }
  0x15   : > { %1034 = vmatpush3.bf16.msra.mxu0 %v1198_v1  ;;  %s922_s26 = sshll.u32 %s1330_s25, 2  ;;  %1152 = vmatpush3.bf16.msra.mxu1 %v1198_v1  ;;  %v1206_v3 = vld [vmem:[%s1326_s23 + $0x40] sm:$0xff]   ;;  %v1209_v10 = vld [vmem:[%s1326_s23 + $0x58] sm:$0xff]   ;;  %v1211_v14 = vld [vmem:[%s1326_s23 + $0x68] sm:$0xff]   ;;  %s1399_s6 = scalar_lea.vmem %s1500_s2, %s1155_s30 }
  0x16   : > { %s1336_s29 = scalar_lea.vmem %s1498_s0, %s922_s26  ;;  %1063 = vmatprep.subr.bf16.mxu1 %v1262_v0  ;;  %1107 = vmatprep.subr.bf16.mxu0 %v1262_v0  ;;  %v1210_v12 = vld [vmem:[%s1326_s23 + $0x60] sm:$0xff]   ;;  %v1212_v15 = vld [vmem:[%s1326_s23 + $0x70] sm:$0xff]   ;;  %v1213_v16 = vld [vmem:[%s1326_s23 + $0x78] sm:$0xff]   ;;  %s924_s7 = sshll.u32 %s1330_s25, 3 }
  0x17   : > { %v1199_v2 = vld [vmem:[%s1336_s29] sm:$0xff]   ;;  %v1200_v5 = vld [vmem:[%s1336_s29 + $0x8] sm:$0xff]   ;;  %v1201_v9 = vld [vmem:[%s1336_s29 + $0x10] sm:$0xff]   ;;  %s1467_s10 = scalar_lea.vmem %s1501_s3, %s924_s7 }
  0x18   : > { %1036 = vmatmul.mubr.msk.bf16.vlgmr.msra.gmra.mrb[0].mxu0 %vm312_vm1, %v1199_v2  ;;  %v1203_v4 = vld [vmem:[%s1336_s29 + $0x20] sm:$0xff]   ;;  %v1204_v8 = vld [vmem:[%s1336_s29 + $0x28] sm:$0xff]   ;;  %v1205_v11 = vld [vmem:[%s1336_s29 + $0x30] sm:$0xff]  }
  0x19   : > { %1039 = vmatprep.mubr.msk.bf16.mxu0 %vm1263_vm0, %v1262_v0  ;;  %1052 = vmatmul.mubr.msk.bf16.vlgmr.msra.gmra.mrb[0].mxu1 %vm312_vm1, %v1203_v4  ;;  %v1202_v13 = vld [vmem:[%s1336_s29 + $0x18] sm:$0xff]   ;;  %v1214_v17 = vld [vmem:[%s1326_s23 + $0x80] sm:$0xff]   ;;  %v1215_v18 = vld [vmem:[%s1326_s23 + $0x88] sm:$0xff]  }
  0x1a   : > { %1055 = vmatprep.mubr.msk.bf16.mxu1 %vm1263_vm0, %v1262_v0  ;;  %1064 = vmatpush3.bf16.msra.mxu1 %v1206_v3  ;;  %v1216_v19 = vld [vmem:[%s1326_s23 + $0x90] sm:$0xff]   ;;  %v1217_v20 = vld [vmem:[%s1326_s23 + $0x98] sm:$0xff]   ;;  %v1218_v21 = vld [vmem:[%s1326_s23 + $0xa0] sm:$0xff]  }
  0x1b   : > { %1065 = vmatprep.subr.bf16.mxu1 %v1262_v0  ;;  %1108 = vmatpush3.bf16.msra.mxu0 %v1214_v17  ;;  %v1219_v22 = vld [vmem:[%s1326_s23 + $0xa8] sm:$0xff]   ;;  %v1402_v23 = vld [vmem:[%s1399_s6] ss:$0 sm:$0xff] }
  0x1c   : > { %1109 = vmatprep.subr.bf16.mxu0 %v1262_v0 }
  0x1e   : > { %1066 = vmatpush3.bf16.msra.mxu1 %v1207_v6 }
  0x1f   : > { %1067 = vmatprep.subr.bf16.mxu1 %v1262_v0  ;;  %1110 = vmatpush3.bf16.msra.mxu0 %v1215_v18 }
  0x20   : > { %1040 = vmatmul.mubr.msk.bf16.gmra.mrb[4].mxu0 %vm312_vm1, %v1200_v5  ;;  %1111 = vmatprep.subr.bf16.mxu0 %v1262_v0 }
  0x21   : > { %1043 = vmatprep.mubr.msk.bf16.mxu0 %vm1263_vm0, %v1262_v0  ;;  %1056 = vmatmul.mubr.msk.bf16.gmra.mrb[4].mxu1 %vm312_vm1, %v1204_v8 }
  0x22   : > { %1059 = vmatprep.mubr.msk.bf16.mxu1 %vm1263_vm0, %v1262_v0  ;;  %1068 = vmatpush3.bf16.msra.mxu1 %v1208_v7 }
  0x23   : > { %1069 = vmatprep.subr.bf16.mxu1 %v1262_v0  ;;  %1112 = vmatpush3.bf16.msra.mxu0 %v1216_v19 }
  0x24   : > { %1113 = vmatprep.subr.bf16.mxu0 %v1262_v0 }
  0x26   : > { %1070 = vmatpush3.bf16.msra.mxu1 %v1209_v10 }
  0x27   : > { %1071 = vmatprep.subr.bf16.mxu1 %v1262_v0  ;;  %1114 = vmatpush3.bf16.msra.mxu0 %v1217_v20 }
  0x28   : > { %1044 = vmatmul.mubr.msk.bf16.gmra.mrb[8].mxu0 %vm312_vm1, %v1201_v9  ;;  %1115 = vmatprep.subr.bf16.mxu0 %v1262_v0 }
  0x29   : > { %1047 = vmatprep.mubr.msk.bf16.mxu0 %vm1263_vm0, %v1262_v0  ;;  %1060 = vmatmul.mubr.msk.bf16.gmra.mrb[8].mxu1 %vm312_vm1, %v1205_v11 }
  0x2a   : > { %1072 = vmatpush3.bf16.msra.mxu1 %v1210_v12  ;;  %1079 = vmatprep.mubr.msk.bf16.mxu1 %vm1263_vm0, %v1262_v0 }
  0x2b   : > { %1073 = vmatprep.subr.bf16.mxu1 %v1262_v0  ;;  %1116 = vmatpush3.bf16.msra.mxu0 %v1218_v21 }
  0x2c   : > { %1117 = vmatprep.subr.bf16.mxu0 %v1262_v0 }
  0x2e   : > { %1074 = vmatpush3.bf16.msra.mxu1 %v1211_v14 }
  0x2f   : > { %1075 = vmatprep.subr.bf16.mxu1 %v1262_v0  ;;  %1118 = vmatpush3.bf16.msra.mxu0 %v1219_v22 }
  0x30   : > { %1048 = vmatmul.mubr.msk.bf16.gmra.mrb[12].mxu0 %vm312_vm1, %v1202_v13  ;;  %1119 = vmatprep.subr.bf16.mxu0 %v1262_v0 }
  0x31   : > { %1123 = vmatprep.mubr.msk.bf16.mxu0 %vm1263_vm0, %v1262_v0 }
  0x32   : > { %1076 = vmatpush3.bf16.msra.mxu1 %v1212_v15 }
  0x33   : > { %1077 = vmatprep.subr.bf16.mxu1 %v1262_v0 }
  0x36   : > { %1078 = vmatpush3.bf16.msra.mxu1 %v1213_v16 }
  0xeb   : > { %v368_v24 = vpop.f32.mrb[0].mxu0 }
  0xec   : > { %v369_v25 = vadd.f32 %v1402_v23, %v368_v24  ;;  %v1037_v26 = vpop.f32.mrb[1].mxu0  ;;  %v400_v30 = vpop.f32.mrb[0].mxu1 }
  0xed   : > { %v371_v27 = vpop.f32.mrb[2].mxu0  ;;  %v401_v33 = vadd.f32 %v1402_v23, %v400_v30  ;;  %v1053_v34 = vpop.f32.mrb[1].mxu1  ;;  %v1434_v26 = vld [vmem:[%s1399_s6 + $0x1] ss:$0 sm:$0xff] }
  0xee   : > { %v372_v28 = vadd.f32 %v1402_v23, %v371_v27  ;;  %v1038_v29 = vpop.f32.mrb[3].mxu0  ;;  %v423_v31 = vmax.f32 %v369_v25, 0.0  ;;  %v403_v35 = vpop.f32.mrb[2].mxu1  ;;  %v1221_v25 = vld [vmem:[%s1326_s23 + $0xb8] sm:$0xff]  }
  0xef   : > { %v431_v37 = vmax.f32 %v401_v33, 0.0  ;;  %v404_v38 = vadd.f32 %v1402_v23, %v403_v35  ;;  %v1054_v39 = vpop.f32.mrb[3].mxu1 }
  0xf0   : > { %v424_v32 = vmax.f32 %v372_v28, 0.0 }
  0xf1   : > { %v432_v43 = vmax.f32 %v404_v38, 0.0 }
  0xf2   : > { %v456_v36 = vpack.c.bf16 %v424_v32, %v423_v31 }
  0xf3   : > { %v376_v40 = vpop.f32.mrb[4].mxu0  ;;  %v460_v47 = vpack.c.bf16 %v432_v43, %v431_v37 }
  0xf4   : > { %v377_v41 = vadd.f32 %v1402_v23, %v376_v40  ;;  %v1041_v42 = vpop.f32.mrb[5].mxu0  ;;  %1080 = vmatmul.mubr.bf16.vlgmr.msra.gmra.mrb[12].mxu1 %v456_v36  ;;  %v408_v48 = vpop.f32.mrb[4].mxu1 }
  0xf5   : > { %v379_v44 = vpop.f32.mrb[6].mxu0  ;;  %1083 = vmatprep.mubr.msk.bf16.mxu1 %vm1263_vm0, %v1262_v0  ;;  %v409_v51 = vadd.f32 %v1402_v23, %v408_v48  ;;  %v1057_v52 = vpop.f32.mrb[5].mxu1 }
  0xf6   : > { %v380_v45 = vadd.f32 %v1402_v23, %v379_v44  ;;  %v1042_v46 = vpop.f32.mrb[7].mxu0  ;;  %v425_v49 = vmax.f32 %v377_v41, 0.0  ;;  %v411_v53 = vpop.f32.mrb[6].mxu1 }
  0xf7   : > { %v433_v55 = vmax.f32 %v409_v51, 0.0  ;;  %v412_v56 = vadd.f32 %v1402_v23, %v411_v53  ;;  %v1058_v57 = vpop.f32.mrb[7].mxu1 }
  0xf8   : > { %v426_v50 = vmax.f32 %v380_v45, 0.0 }
  0xf9   : > { %v434_v61 = vmax.f32 %v412_v56, 0.0 }
  0xfa   : > { %v457_v54 = vpack.c.bf16 %v426_v50, %v425_v49 }
  0xfb   : > { %v384_v58 = vpop.f32.mrb[8].mxu0  ;;  %v461_v2 = vpack.c.bf16 %v434_v61, %v433_v55 }
  0xfc   : > { %v385_v59 = vadd.f32 %v1402_v23, %v384_v58  ;;  %v1045_v60 = vpop.f32.mrb[9].mxu0  ;;  %1084 = vmatmul.mubr.bf16.gmra.mrb[16].mxu1 %v457_v54  ;;  %v416_v3 = vpop.f32.mrb[8].mxu1 }
  0xfd   : > { %v387_v62 = vpop.f32.mrb[10].mxu0  ;;  %1087 = vmatprep.mubr.msk.bf16.mxu1 %vm1263_vm0, %v1262_v0  ;;  %v417_v6 = vadd.f32 %v1402_v23, %v416_v3  ;;  %v1061_v7 = vpop.f32.mrb[9].mxu1 }
  0xfe   : > { %v388_v63 = vadd.f32 %v1402_v23, %v387_v62  ;;  %v1046_v1 = vpop.f32.mrb[11].mxu0  ;;  %v427_v4 = vmax.f32 %v385_v59, 0.0  ;;  %v419_v8 = vpop.f32.mrb[10].mxu1 }
  0xff   : > { %v435_v10 = vmax.f32 %v417_v6, 0.0  ;;  %v420_v11 = vadd.f32 %v1402_v23, %v419_v8  ;;  %v1062_v12 = vpop.f32.mrb[11].mxu1 }
 0x100   : > { %v428_v5 = vmax.f32 %v388_v63, 0.0 }
 0x101   : > { %v436_v16 = vmax.f32 %v420_v11, 0.0 }
 0x102   : > { %v458_v9 = vpack.c.bf16 %v428_v5, %v427_v4 }
 0x103   : > { %v392_v13 = vpop.f32.mrb[12].mxu0  ;;  %v462_v20 = vpack.c.bf16 %v436_v16, %v435_v10 }
 0x104   : > { %v393_v14 = vadd.f32 %v1402_v23, %v392_v13  ;;  %v1049_v15 = vpop.f32.mrb[13].mxu0  ;;  %1088 = vmatmul.mubr.bf16.gmra.mrb[20].mxu1 %v458_v9 }
 0x105   : > { %v395_v17 = vpop.f32.mrb[14].mxu0  ;;  %1091 = vmatprep.mubr.msk.bf16.mxu1 %vm1263_vm0, %v1262_v0 }
 0x106   : > { %v396_v18 = vadd.f32 %v1402_v23, %v395_v17  ;;  %v1050_v19 = vpop.f32.mrb[15].mxu0  ;;  %v429_v21 = vmax.f32 %v393_v14, 0.0  ;;  %v1220_v23 = vld [vmem:[%s1326_s23 + $0xb0] sm:$0xff]  }
 0x107   : > { %1120 = vmatpush3.bf16.msra.mxu0 %v1220_v23 }
 0x108   : > { %v430_v22 = vmax.f32 %v396_v18, 0.0  ;;  %1121 = vmatprep.subr.bf16.mxu0 %v1262_v0 }
 0x10a   : > { %v459_v24 = vpack.c.bf16 %v430_v22, %v429_v21 }
 0x10b   : > { %1122 = vmatpush3.bf16.msra.mxu0 %v1221_v25 }
 0x10c   : > { %1092 = vmatmul.mubr.bf16.gmra.mrb[24].mxu1 %v459_v24 }
 0x10d   : > { %1095 = vmatprep.mubr.msk.bf16.mxu1 %vm1263_vm0, %v1262_v0 }
 0x114   : > { %1096 = vmatmul.mubr.bf16.gmra.mrb[28].mxu1 %v460_v47 }
 0x115   : > { %1099 = vmatprep.mubr.msk.bf16.mxu1 %vm1263_vm0, %v1262_v0 }
 0x11c   : > { %1100 = vmatmul.mubr.bf16.gmra.mrb[32].mxu1 %v461_v2 }
 0x11d   : > { %1103 = vmatprep.mubr.msk.bf16.mxu1 %vm1263_vm0, %v1262_v0 }
 0x124   : > { %1104 = vmatmul.mubr.bf16.gmra.mrb[36].mxu1 %v462_v20 }
 0x1c7   : > { %v551_v27 = vpop.f32.mrb[12].mxu1 }
 0x1c8   : > { %v552_v28 = vadd.f32 %v1434_v26, %v551_v27  ;;  %v1081_v29 = vpop.f32.mrb[13].mxu1 }
 0x1c9   : > { %v554_v30 = vpop.f32.mrb[14].mxu1 }
 0x1ca   : > { %v555_v31 = vadd.f32 %v1434_v26, %v554_v30  ;;  %v1082_v32 = vpop.f32.mrb[15].mxu1  ;;  %v606_v33 = vmax.f32 %v552_v28, 0.0  ;;  %v984_v28 = vld [vmem:[%s1399_s6 + $0x2] ss:$0 sm:$0xff] }
 0x1cc   : > { %v607_v34 = vmax.f32 %v555_v31, 0.0 }
 0x1ce   : > { %v639_v35 = vpack.c.bf16 %v607_v34, %v606_v33 }
 0x1cf   : > { %v559_v36 = vpop.f32.mrb[16].mxu1 }
 0x1d0   : > { %v560_v37 = vadd.f32 %v1434_v26, %v559_v36  ;;  %v1085_v38 = vpop.f32.mrb[17].mxu1  ;;  %1124 = vmatmul.mubr.bf16.vlgmr.msra.gmra.mrb[16].mxu0 %v639_v35 }
 0x1d1   : > { %v562_v39 = vpop.f32.mrb[18].mxu1  ;;  %1127 = vmatprep.mubr.msk.bf16.mxu0 %vm1263_vm0, %v1262_v0 }
 0x1d2   : > { %v563_v40 = vadd.f32 %v1434_v26, %v562_v39  ;;  %v1086_v41 = vpop.f32.mrb[19].mxu1  ;;  %v608_v42 = vmax.f32 %v560_v37, 0.0 }
 0x1d4   : > { %v609_v43 = vmax.f32 %v563_v40, 0.0 }
 0x1d6   : > { %v640_v44 = vpack.c.bf16 %v609_v43, %v608_v42 }
 0x1d7   : > { %v567_v45 = vpop.f32.mrb[20].mxu1 }
 0x1d8   : > { %v568_v46 = vadd.f32 %v1434_v26, %v567_v45  ;;  %v1089_v47 = vpop.f32.mrb[21].mxu1  ;;  %1128 = vmatmul.mubr.bf16.gmra.mrb[20].mxu0 %v640_v44 }
 0x1d9   : > { %v570_v48 = vpop.f32.mrb[22].mxu1  ;;  %1131 = vmatprep.mubr.msk.bf16.mxu0 %vm1263_vm0, %v1262_v0 }
 0x1da   : > { %v571_v49 = vadd.f32 %v1434_v26, %v570_v48  ;;  %v1090_v50 = vpop.f32.mrb[23].mxu1  ;;  %v610_v51 = vmax.f32 %v568_v46, 0.0 }
 0x1dc   : > { %v611_v52 = vmax.f32 %v571_v49, 0.0 }
 0x1de   : > { %v641_v53 = vpack.c.bf16 %v611_v52, %v610_v51 }
 0x1df   : > { %v575_v54 = vpop.f32.mrb[24].mxu1 }
 0x1e0   : > { %v576_v55 = vadd.f32 %v1434_v26, %v575_v54  ;;  %v1093_v56 = vpop.f32.mrb[25].mxu1  ;;  %1132 = vmatmul.mubr.bf16.gmra.mrb[24].mxu0 %v641_v53 }
 0x1e1   : > { %v578_v57 = vpop.f32.mrb[26].mxu1  ;;  %1135 = vmatprep.mubr.msk.bf16.mxu0 %vm1263_vm0, %v1262_v0 }
 0x1e2   : > { %v579_v58 = vadd.f32 %v1434_v26, %v578_v57  ;;  %v1094_v59 = vpop.f32.mrb[27].mxu1  ;;  %v612_v60 = vmax.f32 %v576_v55, 0.0 }
 0x1e4   : > { %v613_v61 = vmax.f32 %v579_v58, 0.0 }
 0x1e6   : > { %v642_v62 = vpack.c.bf16 %v613_v61, %v612_v60 }
 0x1e7   : > { %v583_v63 = vpop.f32.mrb[28].mxu1 }
 0x1e8   : > { %v584_v1 = vadd.f32 %v1434_v26, %v583_v63  ;;  %v1097_v2 = vpop.f32.mrb[29].mxu1  ;;  %1136 = vmatmul.mubr.bf16.gmra.mrb[28].mxu0 %v642_v62 }
 0x1e9   : > { %v586_v3 = vpop.f32.mrb[30].mxu1  ;;  %1139 = vmatprep.mubr.msk.bf16.mxu0 %vm1263_vm0, %v1262_v0 }
 0x1ea   : > { %v587_v4 = vadd.f32 %v1434_v26, %v586_v3  ;;  %v1098_v5 = vpop.f32.mrb[31].mxu1  ;;  %v614_v6 = vmax.f32 %v584_v1, 0.0 }
 0x1ec   : > { %v615_v7 = vmax.f32 %v587_v4, 0.0 }
 0x1ee   : > { %v643_v8 = vpack.c.bf16 %v615_v7, %v614_v6 }
 0x1ef   : > { %v591_v9 = vpop.f32.mrb[32].mxu1 }
 0x1f0   : > { %v592_v10 = vadd.f32 %v1434_v26, %v591_v9  ;;  %v1101_v11 = vpop.f32.mrb[33].mxu1  ;;  %1140 = vmatmul.mubr.bf16.gmra.mrb[32].mxu0 %v643_v8 }
 0x1f1   : > { %v594_v12 = vpop.f32.mrb[34].mxu1  ;;  %1143 = vmatprep.mubr.msk.bf16.mxu0 %vm1263_vm0, %v1262_v0 }
 0x1f2   : > { %v595_v13 = vadd.f32 %v1434_v26, %v594_v12  ;;  %v1102_v14 = vpop.f32.mrb[35].mxu1  ;;  %v616_v15 = vmax.f32 %v592_v10, 0.0 }
 0x1f4   : > { %v617_v16 = vmax.f32 %v595_v13, 0.0 }
 0x1f6   : > { %v644_v17 = vpack.c.bf16 %v617_v16, %v616_v15 }
 0x1f7   : > { %v599_v18 = vpop.f32.mrb[36].mxu1 }
 0x1f8   : > { %v600_v19 = vadd.f32 %v1434_v26, %v599_v18  ;;  %v1105_v20 = vpop.f32.mrb[37].mxu1  ;;  %1144 = vmatmul.mubr.bf16.gmra.mrb[36].mxu0 %v644_v17 }
 0x1f9   : > { %v602_v21 = vpop.f32.mrb[38].mxu1  ;;  %1147 = vmatprep.mubr.msk.bf16.mxu0 %vm1263_vm0, %v1262_v0 }
 0x1fa   : > { %v603_v22 = vadd.f32 %v1434_v26, %v602_v21  ;;  %v1106_v24 = vpop.f32.mrb[39].mxu1  ;;  %v618_v23 = vmax.f32 %v600_v19, 0.0 }
 0x1fc   : > { %v619_v25 = vmax.f32 %v603_v22, 0.0 }
 0x1fe   : > { %v645_v27 = vpack.c.bf16 %v619_v25, %v618_v23 }
 0x200   : > { %1148 = vmatmul.mubr.bf16.gmra.mrb[40].mxu0 %v645_v27 }
 0x2a3   : > { %v734_v29 = vpop.f32.mrb[16].mxu0 }
 0x2a4   : > { %v735_v0 = vadd.f32 %v984_v28, %v734_v29  ;;  %v1125_v30 = vpop.f32.mrb[17].mxu0 }
 0x2a5   : > { %v737_v26 = vpop.f32.mrb[18].mxu0 }
 0x2a6   : > { %789 = vst [vmem:[%s1467_s10] sm:$0xff] %v735_v0  ;;  %v738_v31 = vadd.f32 %v984_v28, %v737_v26  ;;  %v1126_v32 = vpop.f32.mrb[19].mxu0 }
 0x2a8   : > { %790 = vst [vmem:[%s1467_s10 + $0x8] sm:$0xff] %v738_v31 }
 0x2ab   : > { %v742_v33 = vpop.f32.mrb[20].mxu0 }
 0x2ac   : > { %v743_v34 = vadd.f32 %v984_v28, %v742_v33  ;;  %v1129_v35 = vpop.f32.mrb[21].mxu0 }
 0x2ad   : > { %v745_v36 = vpop.f32.mrb[22].mxu0 }
 0x2ae   : > { %791 = vst [vmem:[%s1467_s10 + $0x10] sm:$0xff] %v743_v34  ;;  %v746_v37 = vadd.f32 %v984_v28, %v745_v36  ;;  %v1130_v38 = vpop.f32.mrb[23].mxu0 }
 0x2b0   : > { %792 = vst [vmem:[%s1467_s10 + $0x18] sm:$0xff] %v746_v37 }
 0x2b3   : > { %v750_v39 = vpop.f32.mrb[24].mxu0 }
 0x2b4   : > { %v751_v40 = vadd.f32 %v984_v28, %v750_v39  ;;  %v1133_v41 = vpop.f32.mrb[25].mxu0 }
 0x2b5   : > { %v753_v42 = vpop.f32.mrb[26].mxu0 }
 0x2b6   : > { %793 = vst [vmem:[%s1467_s10 + $0x20] sm:$0xff] %v751_v40  ;;  %v754_v43 = vadd.f32 %v984_v28, %v753_v42  ;;  %v1134_v44 = vpop.f32.mrb[27].mxu0 }
 0x2b8   : > { %794 = vst [vmem:[%s1467_s10 + $0x28] sm:$0xff] %v754_v43 }
 0x2bb   : > { %v758_v45 = vpop.f32.mrb[28].mxu0 }
 0x2bc   : > { %v759_v46 = vadd.f32 %v984_v28, %v758_v45  ;;  %v1137_v47 = vpop.f32.mrb[29].mxu0 }
 0x2bd   : > { %v761_v48 = vpop.f32.mrb[30].mxu0 }
 0x2be   : > { %795 = vst [vmem:[%s1467_s10 + $0x30] sm:$0xff] %v759_v46  ;;  %v762_v49 = vadd.f32 %v984_v28, %v761_v48  ;;  %v1138_v50 = vpop.f32.mrb[31].mxu0 }
 0x2c0   : > { %796 = vst [vmem:[%s1467_s10 + $0x38] sm:$0xff] %v762_v49 }
 0x2c3   : > { %v766_v51 = vpop.f32.mrb[32].mxu0 }
 0x2c4   : > { %v767_v52 = vadd.f32 %v984_v28, %v766_v51  ;;  %v1141_v53 = vpop.f32.mrb[33].mxu0 }
 0x2c5   : > { %v769_v54 = vpop.f32.mrb[34].mxu0 }
 0x2c6   : > { %797 = vst [vmem:[%s1467_s10 + $0x40] sm:$0xff] %v767_v52  ;;  %v770_v55 = vadd.f32 %v984_v28, %v769_v54  ;;  %v1142_v56 = vpop.f32.mrb[35].mxu0 }
 0x2c8   : > { %798 = vst [vmem:[%s1467_s10 + $0x48] sm:$0xff] %v770_v55 }
 0x2cb   : > { %v774_v57 = vpop.f32.mrb[36].mxu0 }
 0x2cc   : > { %v775_v58 = vadd.f32 %v984_v28, %v774_v57  ;;  %v1145_v59 = vpop.f32.mrb[37].mxu0 }
 0x2cd   : > { %v777_v60 = vpop.f32.mrb[38].mxu0 }
 0x2ce   : > { %799 = vst [vmem:[%s1467_s10 + $0x50] sm:$0xff] %v775_v58  ;;  %v778_v61 = vadd.f32 %v984_v28, %v777_v60  ;;  %v1146_v62 = vpop.f32.mrb[39].mxu0 }
 0x2d0   : > { %800 = vst [vmem:[%s1467_s10 + $0x58] sm:$0xff] %v778_v61 }
 0x2d3   : > { %v782_v63 = vpop.f32.mrb[40].mxu0 }
 0x2d4   : > { %v783_v1 = vadd.f32 %v984_v28, %v782_v63  ;;  %v1149_v2 = vpop.f32.mrb[41].mxu0 }
 0x2d5   : > { %v785_v3 = vpop.f32.mrb[42].mxu0 }
 0x2d6   : > { %801 = vst [vmem:[%s1467_s10 + $0x60] sm:$0xff] %v783_v1  ;;  %v786_v4 = vadd.f32 %v984_v28, %v785_v3  ;;  %v1150_v5 = vpop.f32.mrb[43].mxu0 }
 0x2d8   : > { %802 = vst [vmem:[%s1467_s10 + $0x68] sm:$0xff] %v786_v4 }
 0x2d9 PF: > { %s13_s16 = sadd.s32 1, %s1260_s16   ;;  %s1502_s12 = smov %s1252_s14 }
 0x2da   : > { %p10_p7 = scmp.ge.s32.totalorder %s13_s16, 8   ;;  %s1503_s13 = smov %s1256_s15 }
 0x2db   : > { %s1504_s14 = smov %s1507_s17  ;;  %s1505_s15 = smov %s1511_s18 }
 0x2dc   :  { %12 = sbr.rel (!%p10_p7) target bundleno = 3 (0x3), region = 72 }

</bundles_post_ra>
